<compile_context>
chip_gen: v7x
topology: tpu7x:2x2x1
jax: 0.10.0
libtpu: 0.0.40
codegen_flags: <defaults>
</compile_context>

<pallas_src>
import jax
import jax.numpy as jnp
from jax.experimental import pallas as pl
from jax.experimental.pallas import tpu as pltpu


def _round_up(x, m):
    return ((x + m - 1) // m) * m


def cnn_forward(x, weight, bias):
    """Conv1d(valid) -> ReLU -> max over time.

    x:      (B, C_in, L)        float32
    weight: (C_out, C_in, k)    float32  (PyTorch Conv1d weight layout)
    bias:   (C_out,)            float32
    returns (B, C_out)          float32
    """
    B, C_in, L = x.shape
    C_out, _, k = weight.shape
    L_out = L - k + 1                       # 'valid' conv output length
    Kc = k * C_in                           # folded contraction depth
    Cp = _round_up(C_out, 128)              # lane-dense output / MXU N dim

    # ---- batch tiling --------------------------------------------------
    # Aim for ~2048 flattened matmul rows (M = L_out * tb) per grid step,
    # but keep the 'parallel' batch grid at >= 2 steps when B allows it
    # (v7x: 2 TensorCores share the parallel axis).
    B8 = _round_up(B, 8)
    tb = min(max(8, (2048 // max(L_out, 1)) // 8 * 8), B8)
    if B8 // tb < 2 and B8 >= 16:
        tb = max(8, (B8 // 2) // 8 * 8)
    B_pad = _round_up(B, tb)
    grid = (B_pad // tb,)
    M = L_out * tb                          # flattened matmul rows per step

    # ---- wrapper-side layout glue (one pass; no k-fold im2col in HBM) ---
    # x: (B, C_in, L) -> (L, B_pad, C_in), bf16, batch zero-padded.
    x_t = jnp.transpose(x, (2, 0, 1)).astype(jnp.bfloat16)
    x_t = jnp.pad(x_t, ((0, 0), (0, B_pad - B), (0, 0)))
    # weight: (C_out, C_in, k) -> (Kc, Cp) with row index j*C_in + c.
    w_t = jnp.transpose(weight, (2, 1, 0)).reshape(Kc, C_out)
    w_t = jnp.pad(w_t, ((0, 0), (0, Cp - C_out))).astype(jnp.bfloat16)
    # bias: (C_out,) -> (1, Cp), f32, zero-padded channels.
    b_t = jnp.pad(bias, (0, Cp - C_out)).reshape(1, Cp).astype(jnp.float32)

    def kernel(x_ref, w_ref, b_ref, o_ref):
        # x_ref: (L, tb, C_in) bf16   w_ref: (Kc, Cp) bf16
        # b_ref: (1, Cp) f32          o_ref: (tb, Cp) f32
        xv = x_ref[...]
        # Unfold: k static time shifts are *major-axis* slices (no sublane
        # relayout); concatenate them along lanes -> (L_out, tb, Kc).
        taps = [xv[j:j + L_out] for j in range(k)]
        xs = jnp.concatenate(taps, axis=-1)
        xs = xs.reshape(M, Kc)                       # free: tb % 8 == 0
        # Single folded MXU matmul, f32 accumulation.
        acc = jnp.dot(xs, w_ref[...], preferred_element_type=jnp.float32)
        acc = jnp.maximum(acc + b_ref[...], 0.0)     # bias + ReLU (f32)
        acc = acc.reshape(L_out, tb, Cp)             # free split
        # Max over time = major-axis reduction over exactly L_out slabs
        # (no padded time rows -> no mask needed).
        o_ref[...] = jnp.max(acc, axis=0).astype(o_ref.dtype)

    grid_spec = pltpu.PrefetchScalarGridSpec(
        num_scalar_prefetch=0,
        grid=grid,
        in_specs=[
            pl.BlockSpec((L, tb, C_in), lambda g: (0, g, 0)),  # batch tile of raw x
            pl.BlockSpec((Kc, Cp), lambda g: (0, 0)),          # resident weights
            pl.BlockSpec((1, Cp), lambda g: (0, 0)),           # resident bias
        ],
        out_specs=pl.BlockSpec((tb, Cp), lambda g: (g, 0)),
    )

    out = pl.pallas_call(
        kernel,
        out_shape=jax.ShapeDtypeStruct((B_pad, Cp), jnp.float32),
        grid_spec=grid_spec,
        compiler_params=pltpu.CompilerParams(
            dimension_semantics=("parallel",),
        ),
    )(x_t, w_t, b_t)

    return out[:B, :C_out]


def cnn_reference(x, weight, bias):
    """Pure-JAX reference of the PyTorch forward."""
    B, C_in, L = x.shape
    C_out, _, k = weight.shape
    L_out = L - k + 1
    idx = jnp.arange(L_out)[:, None] + jnp.arange(k)[None, :]
    xu = x[:, :, idx]                                            # (B, C_in, L_out, k)
    conv = jnp.einsum("bclk,ock->bol", xu, weight) + bias[None, :, None]
    return jnp.max(jax.nn.relu(conv), axis=2)


if __name__ == "__main__":
    # Small shapes consistent with the module: e_char=4 input channels,
    # embed_size=32, kernel size k=5, word length 16, batch 2.
    B, C_in, L = 2, 4, 16
    C_out, k = 32, 5

    key = jax.random.PRNGKey(0)
    kx, kw, kb = jax.random.split(key, 3)

    x = jax.random.normal(kx, (B, C_in, L), dtype=jnp.float32)
    bound = 1.0 / jnp.sqrt(C_in * k)
    weight = jax.random.uniform(kw, (C_out, C_in, k), jnp.float32, -bound, bound)
    bias = jax.random.uniform(kb, (C_out,), jnp.float32, -bound, bound)

    out = jax.block_until_ready(cnn_forward(x, weight, bias))

    # Reference on bf16-rounded inputs (kernel matmul runs bf16 with f32 accum),
    # plus a loose check against the full f32 reference.
    xr = x.astype(jnp.bfloat16).astype(jnp.float32)
    wr = weight.astype(jnp.bfloat16).astype(jnp.float32)
    ref_bf16 = cnn_reference(xr, wr, bias)
    ref_f32 = cnn_reference(x, weight, bias)

    assert out.shape == (B, C_out), out.shape
    assert jnp.allclose(out, ref_bf16, atol=2e-3, rtol=2e-3), "mismatch vs bf16 reference"
    assert jnp.allclose(out, ref_f32, atol=1e-1, rtol=1e-1), "mismatch vs f32 reference"

    print("KERNEL_OK")
</pallas_src>

<mosaic_0001>
module attributes {stable_mosaic.version = 11 : i64} {
  func.func @kernel(%arg0: i32, %arg1: memref<16x8x4xbf16, #tpu.memory_space<vmem>>, %arg2: memref<20x128xbf16, #tpu.memory_space<vmem>>, %arg3: memref<1x128xf32, #tpu.memory_space<vmem>>, %arg4: memref<8x128xf32, #tpu.memory_space<vmem>>) attributes {dimension_semantics = [#tpu.dimension_semantics<parallel>], iteration_bounds = array<i64: 1>, scalar_prefetch = 0 : i64, scratch_operands = 0 : i64, tpu.core_type = #tpu.core_type<tc>, window_params = [{transform_indices = @transform_0, window_bounds = array<i64: 16, 8, 4>}, {pipeline_mode = #tpu.pipeline_mode<synchronous>, transform_indices = @transform_1, window_bounds = array<i64: 20, 128>}, {pipeline_mode = #tpu.pipeline_mode<synchronous>, transform_indices = @transform_2, window_bounds = array<i64: 1, 128>}, {transform_indices = @transform_3, window_bounds = array<i64: 8, 128>}]} {
    %c0 = arith.constant 0 : index
    %c0_0 = arith.constant 0 : index
    %c0_1 = arith.constant 0 : index
    %0 = vector.load %arg1[%c0, %c0_0, %c0_1] : memref<16x8x4xbf16, #tpu.memory_space<vmem>>, vector<16x8x4xbf16>
    %1 = vector.extract_strided_slice %0 {offsets = [0, 0, 0], sizes = [12, 8, 4], strides = [1, 1, 1]} : vector<16x8x4xbf16> to vector<12x8x4xbf16>
    %2 = vector.extract_strided_slice %0 {offsets = [1, 0, 0], sizes = [12, 8, 4], strides = [1, 1, 1]} : vector<16x8x4xbf16> to vector<12x8x4xbf16>
    %3 = vector.extract_strided_slice %0 {offsets = [2, 0, 0], sizes = [12, 8, 4], strides = [1, 1, 1]} : vector<16x8x4xbf16> to vector<12x8x4xbf16>
    %4 = vector.extract_strided_slice %0 {offsets = [3, 0, 0], sizes = [12, 8, 4], strides = [1, 1, 1]} : vector<16x8x4xbf16> to vector<12x8x4xbf16>
    %5 = vector.extract_strided_slice %0 {offsets = [4, 0, 0], sizes = [12, 8, 4], strides = [1, 1, 1]} : vector<16x8x4xbf16> to vector<12x8x4xbf16>
    %6 = tpu.concatenate %1, %2, %3, %4, %5 in 2 : vector<12x8x4xbf16>, vector<12x8x4xbf16>, vector<12x8x4xbf16>, vector<12x8x4xbf16>, vector<12x8x4xbf16> -> vector<12x8x20xbf16>
    %7 = vector.shape_cast %6 : vector<12x8x20xbf16> to vector<96x20xbf16>
    %c0_2 = arith.constant 0 : index
    %c0_3 = arith.constant 0 : index
    %8 = vector.load %arg2[%c0_2, %c0_3] : memref<20x128xbf16, #tpu.memory_space<vmem>>, vector<20x128xbf16>
    %cst = arith.constant dense<0.000000e+00> : vector<96x128xf32>
    %9 = tpu.matmul %7, %8, %cst {dimension_numbers = #tpu.dot_dimension_numbers<[1], [0], [0], [1], [0, 0, 1, 1], [], []>} : vector<96x20xbf16>, vector<20x128xbf16>, vector<96x128xf32> -> vector<96x128xf32>
    %c0_4 = arith.constant 0 : index
    %c0_5 = arith.constant 0 : index
    %10 = vector.load %arg3[%c0_4, %c0_5] : memref<1x128xf32, #tpu.memory_space<vmem>>, vector<1x128xf32>
    %11 = vector.broadcast %10 : vector<1x128xf32> to vector<96x128xf32>
    %12 = arith.addf %9, %11 : vector<96x128xf32>
    %cst_6 = arith.constant 0.000000e+00 : f32
    %13 = vector.broadcast %cst_6 : f32 to vector<96x128xf32>
    %14 = arith.maximumf %12, %13 : vector<96x128xf32>
    %15 = vector.shape_cast %14 : vector<96x128xf32> to vector<12x8x128xf32>
    %cst_7 = arith.constant dense<0xFF800000> : vector<8x128xf32>
    %16 = vector.multi_reduction <maximumf>, %15, %cst_7 [0] : vector<12x8x128xf32> to vector<8x128xf32>
    %c0_8 = arith.constant 0 : index
    %c0_9 = arith.constant 0 : index
    %17 = vector.load %arg4[%c0_8, %c0_9] : memref<8x128xf32, #tpu.memory_space<vmem>>, vector<8x128xf32>
    tpu.vector_store %arg4[%c0_8, %c0_9], %16 {strides = array<i32>} : memref<8x128xf32, #tpu.memory_space<vmem>>, vector<8x128xf32>,
    return
  }
  func.func @transform_0(%arg0: i32) -> (i32, i32, i32) {
    %c0_i32 = arith.constant 0 : i32
    %c0_i32_0 = arith.constant 0 : i32
    %c0_i32_1 = arith.constant 0 : i32
    return %c0_i32, %arg0, %c0_i32_0 : i32, i32, i32
  }
  func.func @transform_1(%arg0: i32) -> (i32, i32) {
    %c0_i32 = arith.constant 0 : i32
    %c0_i32_0 = arith.constant 0 : i32
    %c0_i32_1 = arith.constant 0 : i32
    return %c0_i32, %c0_i32_0 : i32, i32
  }
  func.func @transform_2(%arg0: i32) -> (i32, i32) {
    %c0_i32 = arith.constant 0 : i32
    %c0_i32_0 = arith.constant 0 : i32
    %c0_i32_1 = arith.constant 0 : i32
    return %c0_i32, %c0_i32_0 : i32, i32
  }
  func.func @transform_3(%arg0: i32) -> (i32, i32) {
    %c0_i32 = arith.constant 0 : i32
    %c0_i32_0 = arith.constant 0 : i32
    return %arg0, %c0_i32 : i32, i32
  }
}

</mosaic_0001>

<bundles_post_ra>
// kernel: tpu_custom_call.1
= control target key start
LH: loop header
LB: loop body
LE: loop exit
PB: predicated region body
PF: predicated region fallthrough
CT: control target
= control target key end

     0   :  { %s582_s20 = smov 4   ;;  %s846_s0 = inlined_call_operand.vmem [shape: bf16[16,8,4], index: 0, kind: input, shape index: {}]   ;;  %s847_s1 = inlined_call_operand.vmem [shape: bf16[20,128], index: 1, kind: input, shape index: {}]   ;;  %s848_s2 = inlined_call_operand.vmem [shape: f32[1,128], index: 2, kind: input, shape index: {}]   ;;  %s849_s3 = inlined_call_operand.hbm [shape: f32[8,128], index: 3, kind: output, shape index: {}]  }
   0x1   :  { %v610_v0 = vld [vmem:[%s846_s0 + $0x1c] sm:$0xf]  ;;  %v615_v1 = vld [vmem:[%s846_s0 + $0x14] sm:$0xf]  ;;  %v628_v4 = vld [vmem:[%s846_s0 + $0x20] sm:$0xf] }
   0x2   :  { %v619_v2 = vcombine.low %v610_v0, %v610_v0  ;;  %v623_v3 = vcombine.low %v615_v1, %v615_v1  ;;  %v633_v5 = vld [vmem:[%s846_s0 + $0x18] sm:$0xf]  ;;  %v483_v6 = vcombine.low %v628_v4, %v628_v4  ;;  %v651_v8 = vld [vmem:[%s846_s0 + $0x24] sm:$0xf] }
   0x3   :  { %v643_v7 = vcombine.low %v633_v5, %v633_v5 }
   0x4   :  { %80 = vrot.lane.b32.xlu1 %v619_v2, %s582_s20  ;;  %76 = vrot.lane.b32.xlu0 %v623_v3, %s582_s20 }
   0x8   :  { %82 = vrot.lane.b32.xlu1 %v483_v6, %s582_s20  ;;  %78 = vrot.lane.b32.xlu0 %v643_v7, %s582_s20 }
   0x9   :  { %8 = vsyncpa [#allocation3], 0  ;;  %v556_v9 = vld [vmem:[%s847_s1] sm:$0xff]   ;;  %s583_s25 = smov 8   ;;  %v484_v10 = vcombine.low %v651_v8, %v651_v8  ;;  %vm353_vm0 = vcmask 1041408   ;;  %s584_s30 = smov 12  }
   0xa   :  { %530 = vmatprep.subr.bf16.mxu1 %v556_v9  ;;  %514 = vmatprep.subr.bf16.mxu0 %v556_v9  ;;  %v557_v11 = vld [vmem:[%s847_s1 + $0x8] ss:$0 sps:$4 sm:$0x33]   ;;  %v682_v15 = vld [vmem:[%s846_s0 + $0x2c] sm:$0xf]  ;;  %s585_s5 = smov 16  }
   0xb   :  { %532 = vmatpush3.bf16.msra.mxu1 %v556_v9  ;;  %515 = vmatpush3.bf16.msra.mxu0 %v556_v9  ;;  %v670_v12 = vld [vmem:[%s846_s0 + $0x28] sm:$0xf]  ;;  %v355_v13 = vsel %vm353_vm0, %v557_v11, 0  ;;  %v486_v16 = vcombine.low %v682_v15, %v682_v15  ;;  %v696_v18 = vld [vmem:[%s846_s0 + $0x4] sm:$0xf]  ;;  %vm173_vm1 = vcmask 31744  }
   0xc   :  { %105 = vrot.lane.b32.xlu1 %v619_v2, %s583_s25  ;;  %103 = vrot.lane.b32.xlu0 %v643_v7, %s583_s25  ;;  %v485_v14 = vcombine.low %v670_v12, %v670_v12  ;;  %v691_v17 = vld [vmem:[%s846_s0 + $0x8] sm:$0xf]  ;;  %v476_v20 = vcombine.low %v696_v18, %v696_v18  ;;  %v20_v21 = vld [vmem:[%s846_s0 + $0x10] sm:$0xf]  ;;  %vm210_vm2 = vcmask 64512   ;;  %vm235_vm3 = vcmask 97280  }
   0xd   :  { %535 = vmatprep.subr.msk.bf16.mxu1 %vm353_vm0, %v557_v11  ;;  %534 = vmatprep.subr.msk.bf16.mxu0 %vm353_vm0, %v557_v11  ;;  %v477_v19 = vcombine.low %v691_v17, %v691_v17  ;;  %v710_v22 = vld [vmem:[%s846_s0 + $0xc] sm:$0xf]  ;;  %v479_v23 = vcombine.low %v20_v21, %v20_v21  ;;  %v552_v25 = vld [vmem:[%s846_s0 + $0x30] ss:$0 sps:$4 sm:$0xff]   ;;  %v553_v26 = vld [vmem:[%s846_s0 + $0x34] ss:$0 sps:$4 sm:$0xff]  }
   0xe   :  { %v478_v24 = vcombine.low %v710_v22, %v710_v22  ;;  %v554_v27 = vld [vmem:[%s846_s0 + $0x38] ss:$0 sps:$4 sm:$0xff]   ;;  %v555_v28 = vld [vmem:[%s846_s0 + $0x3c] ss:$0 sps:$4 sm:$0xff]   ;;  %vm260_vm4 = vcmask 130048   ;;  %vm334_vm5 = vcmask 162816  }
   0xf   :  { %533 = vmatpush3.bf16.msra.mxu1 %v355_v13  ;;  %517 = vmatpush3.bf16.msra.mxu0 %v355_v13 }
  0x10   :  { %109 = vrot.lane.b32.xlu1 %v484_v10, %s583_s25  ;;  %107 = vrot.lane.b32.xlu0 %v483_v6, %s583_s25 }
  0x14   :  { %132 = vrot.lane.b32.xlu1 %v483_v6, %s584_s30  ;;  %130 = vrot.lane.b32.xlu0 %v619_v2, %s584_s30 }
  0x18   :  { %136 = vrot.lane.b32.xlu1 %v485_v14, %s584_s30  ;;  %134 = vrot.lane.b32.xlu0 %v484_v10, %s584_s30 }
  0x1c   :  { %159 = vrot.lane.b32.xlu1 %v484_v10, %s585_s5  ;;  %157 = vrot.lane.b32.xlu0 %v483_v6, %s585_s5 }
  0x20   :  { %163 = vrot.lane.b32.xlu1 %v486_v16, %s585_s5  ;;  %161 = vrot.lane.b32.xlu0 %v485_v14, %s585_s5 }
  0x24   :  { %70 = vrot.lane.b32.xlu1 %v477_v19, %s582_s20  ;;  %68 = vrot.lane.b32.xlu0 %v476_v20, %s582_s20 }
  0x28   :  { %74 = vrot.lane.b32.xlu1 %v479_v23, %s582_s20  ;;  %72 = vrot.lane.b32.xlu0 %v478_v24, %s582_s20 }
  0x2c   :  { %97 = vrot.lane.b32.xlu1 %v478_v24, %s583_s25  ;;  %95 = vrot.lane.b32.xlu0 %v477_v19, %s583_s25 }
  0x30   :  { %86 = vrot.lane.b32.xlu1 %v485_v14, %s582_s20  ;;  %84 = vrot.lane.b32.xlu0 %v484_v10, %s582_s20 }
  0x34   :  { %101 = vrot.lane.b32.xlu1 %v623_v3, %s583_s25  ;;  %99 = vrot.lane.b32.xlu0 %v479_v23, %s583_s25 }
  0x38   :  { %124 = vrot.lane.b32.xlu1 %v479_v23, %s584_s30  ;;  %122 = vrot.lane.b32.xlu0 %v478_v24, %s584_s30 }
  0x3c   :  { %90 = vrot.lane.b32.xlu1 %v552_v25, %s582_s20  ;;  %88 = vrot.lane.b32.xlu0 %v486_v16, %s582_s20 }
  0x40   :  { %113 = vrot.lane.b32.xlu1 %v486_v16, %s583_s25  ;;  %111 = vrot.lane.b32.xlu0 %v485_v14, %s583_s25 }
  0x44   :  { %128 = vrot.lane.b32.xlu1 %v643_v7, %s584_s30  ;;  %126 = vrot.lane.b32.xlu0 %v623_v3, %s584_s30 }
  0x48   :  { %151 = vrot.lane.b32.xlu1 %v623_v3, %s585_s5  ;;  %149 = vrot.lane.b32.xlu0 %v479_v23, %s585_s5 }
  0x4c   :  { %117 = vrot.lane.b32.xlu1 %v553_v26, %s583_s25  ;;  %115 = vrot.lane.b32.xlu0 %v552_v25, %s583_s25 }
  0x50   :  { %140 = vrot.lane.b32.xlu1 %v552_v25, %s584_s30  ;;  %138 = vrot.lane.b32.xlu0 %v486_v16, %s584_s30 }
  0x54   :  { %155 = vrot.lane.b32.xlu1 %v619_v2, %s585_s5  ;;  %153 = vrot.lane.b32.xlu0 %v643_v7, %s585_s5 }
  0x58   :  { %144 = vrot.lane.b32.xlu1 %v554_v27, %s584_s30  ;;  %142 = vrot.lane.b32.xlu0 %v553_v26, %s584_s30 }
  0x5c   :  { %167 = vrot.lane.b32.xlu1 %v553_v26, %s585_s5  ;;  %165 = vrot.lane.b32.xlu0 %v552_v25, %s585_s5  ;;  %v16_v26 = vld [vmem:[%s846_s0] sm:$0xf] }
  0x60   :  { %171 = vrot.lane.b32.xlu1 %v555_v28, %s585_s5  ;;  %169 = vrot.lane.b32.xlu0 %v554_v27, %s585_s5 }
  0x76   :  { %v81_v29 = vpop.permute.xlu1 %80  ;;  %v77_v30 = vpop.permute.xlu0 %76 }
  0x77   :  { %v188_v41 = vsel %vm173_vm1, %v20_v21, %v77_v30  ;;  %v194_v51 = vsel %vm173_vm1, %v633_v5, %v81_v29 }
  0x7a   :  { %v83_v31 = vpop.permute.xlu1 %82  ;;  %v79_v32 = vpop.permute.xlu0 %78 }
  0x7b   :  { %v191_v42 = vsel %vm173_vm1, %v615_v1, %v79_v32  ;;  %v197_v52 = vsel %vm173_vm1, %v610_v0, %v83_v31 }
  0x7e   :  { %v106_v33 = vpop.permute.xlu1 %105  ;;  %v104_v34 = vpop.permute.xlu0 %103 }
  0x7f   :  { %v222_v43 = vsel %vm210_vm2, %v191_v42, %v106_v33  ;;  %v220_v44 = vsel %vm210_vm2, %v188_v41, %v104_v34 }
  0x82   :  { %v110_v35 = vpop.permute.xlu1 %109  ;;  %v108_v36 = vpop.permute.xlu0 %107 }
  0x83   :  { %v226_v54 = vsel %vm210_vm2, %v197_v52, %v110_v35  ;;  %v224_v55 = vsel %vm210_vm2, %v194_v51, %v108_v36 }
  0x86   :  { %v133_v37 = vpop.permute.xlu1 %132  ;;  %v131_v38 = vpop.permute.xlu0 %130 }
  0x87   :  { %v247_v45 = vsel %vm235_vm3, %v222_v43, %v133_v37  ;;  %v245_v46 = vsel %vm235_vm3, %v220_v44, %v131_v38 }
  0x8a   :  { %v137_v39 = vpop.permute.xlu1 %136  ;;  %v135_v40 = vpop.permute.xlu0 %134 }
  0x8b   :  { %v251_v56 = vsel %vm235_vm3, %v226_v54, %v137_v39  ;;  %v249_v57 = vsel %vm235_vm3, %v224_v55, %v135_v40 }
  0x8e   :  { %v160_v47 = vpop.permute.xlu1 %159  ;;  %v158_v48 = vpop.permute.xlu0 %157 }
  0x8f   :  { %v272_v49 = vsel %vm260_vm4, %v247_v45, %v160_v47  ;;  %v270_v50 = vsel %vm260_vm4, %v245_v46, %v158_v48 }
  0x90   :  { %v494_v53 = vcombine.low %v270_v50, %v272_v49 }
  0x92   :  { %v164_v58 = vpop.permute.xlu1 %163  ;;  %v162_v59 = vpop.permute.xlu0 %161  ;;  %522 = vmatprep.mubr.msk.bf16.mxu1 %vm334_vm5, %v494_v53 }
  0x93   :  { %v276_v60 = vsel %vm260_vm4, %v251_v56, %v164_v58  ;;  %v274_v61 = vsel %vm260_vm4, %v249_v57, %v162_v59 }
  0x94   :  { %v495_v62 = vcombine.low %v274_v61, %v276_v60 }
  0x96   :  { %523 = vmatmul.mubr.msk.bf16.vlgmr.msra.gmra.mrb[0].mxu1 %vm334_vm5, %v495_v62  ;;  %v71_v63 = vpop.permute.xlu1 %70  ;;  %v69_v0 = vpop.permute.xlu0 %68 }
  0x97   :  { %v179_v29 = vsel %vm173_vm1, %v696_v18, %v71_v63 }
  0x9a   :  { %v75_v1 = vpop.permute.xlu1 %74  ;;  %v73_v2 = vpop.permute.xlu0 %72 }
  0x9b   :  { %v185_v45 = vsel %vm173_vm1, %v710_v22, %v75_v1  ;;  %v182_v46 = vsel %vm173_vm1, %v691_v17, %v73_v2 }
  0x9e   :  { %v98_v3 = vpop.permute.xlu1 %97  ;;  %v96_v5 = vpop.permute.xlu0 %95 }
  0x9f   :  { %v214_v30 = vsel %vm210_vm2, %v179_v29, %v98_v3 }
  0xa2   :  { %v87_v6 = vpop.permute.xlu1 %86  ;;  %v85_v7 = vpop.permute.xlu0 %84 }
  0xa3   :  { %v203_v19 = vsel %vm173_vm1, %v651_v8, %v87_v6  ;;  %v200_v20 = vsel %vm173_vm1, %v628_v4, %v85_v7  ;;  %v176_v8 = vsel %vm173_vm1, %v16_v26, %v69_v0 }
  0xa4   :  { %v212_v4 = vsel %vm210_vm2, %v176_v8, %v96_v5 }
  0xa6   :  { %v102_v9 = vpop.permute.xlu1 %101  ;;  %v100_v10 = vpop.permute.xlu0 %99 }
  0xaa   :  { %v125_v11 = vpop.permute.xlu1 %124  ;;  %v123_v13 = vpop.permute.xlu0 %122 }
  0xab   :  { %v239_v31 = vsel %vm235_vm3, %v214_v30, %v125_v11  ;;  %v237_v32 = vsel %vm235_vm3, %v212_v4, %v123_v13 }
  0xae   :  { %v91_v14 = vpop.permute.xlu1 %90  ;;  %v89_v16 = vpop.permute.xlu0 %88 }
  0xaf   :  { %v209_v18 = vsel %vm173_vm1, %v682_v15, %v91_v14  ;;  %v206_v38 = vsel %vm173_vm1, %v670_v12, %v89_v16  ;;  %v218_v15 = vsel %vm210_vm2, %v185_v45, %v102_v9  ;;  %v216_v12 = vsel %vm210_vm2, %v182_v46, %v100_v10  ;;  %v491_v10 = vld [vmem:[%s848_s2] ss:$0 sm:$0xff]  ;;  %s586_s2 = smov [#allocation2]  }
  0xb0   :  { %s468_s25 = sshll.u32 %s586_s2, 4  ;;  %s469_s25 = int_to_ptr.vmem [resolvable:$true] %s468_s25 }
  0xb1   :  { %s558_s26 = scalar_lea.vmem %s469_s25, 128  ;;  %p563_p1 = scmp.lt.s32.totalorder %s469_s25, %s469_s25 }
  0xb2   :  { %v114_v21 = vpop.permute.xlu1 %113  ;;  %v112_v23 = vpop.permute.xlu0 %111  ;;  %p559_p0 = scmp.ne.s32.totalorder %s469_s25, %s558_s26  ;;  %p564_p2 = scmp.lt.s32.totalorder %s558_s26, %s558_s26 }
  0xb3   :  { %v230_v24 = vsel %vm210_vm2, %v203_v19, %v114_v21  ;;  %v228_v25 = vsel %vm210_vm2, %v200_v20, %v112_v23 }
  0xb4   :  { %p565_p3 = por %p564_p2, %p563_p1 }
  0xb6   :  { %v129_v27 = vpop.permute.xlu1 %128  ;;  %v127_v28 = vpop.permute.xlu0 %126  ;;  %p566_p4 = pnand %p565_p3, %p559_p0 }
  0xb7   :  { %v243_v47 = vsel %vm235_vm3, %v218_v15, %v129_v27  ;;  %v241_v48 = vsel %vm235_vm3, %v216_v12, %v127_v28 }
  0xba   :  { %v152_v33 = vpop.permute.xlu1 %151  ;;  %v150_v34 = vpop.permute.xlu0 %149 }
  0xbb   :  { %v264_v35 = vsel %vm260_vm4, %v239_v31, %v152_v33  ;;  %v262_v36 = vsel %vm260_vm4, %v237_v32, %v150_v34 }
  0xbc   :  { %v492_v37 = vcombine.low %v262_v36, %v264_v35 }
  0xbe   :  { %v118_v39 = vpop.permute.xlu1 %117  ;;  %v116_v40 = vpop.permute.xlu0 %115  ;;  %518 = vmatprep.mubr.msk.bf16.mxu0 %vm334_vm5, %v492_v37 }
  0xbf   :  { %v234_v41 = vsel %vm210_vm2, %v209_v18, %v118_v39  ;;  %v232_v42 = vsel %vm210_vm2, %v206_v38, %v116_v40 }
  0xc2   :  { %v141_v43 = vpop.permute.xlu1 %140  ;;  %v139_v44 = vpop.permute.xlu0 %138 }
  0xc3   :  { %v255_v17 = vsel %vm235_vm3, %v230_v24, %v141_v43  ;;  %v253_v55 = vsel %vm235_vm3, %v228_v25, %v139_v44 }
  0xc6   :  { %v156_v49 = vpop.permute.xlu1 %155  ;;  %v154_v50 = vpop.permute.xlu0 %153 }
  0xc7   :  { %v268_v51 = vsel %vm260_vm4, %v243_v47, %v156_v49  ;;  %v266_v52 = vsel %vm260_vm4, %v241_v48, %v154_v50 }
  0xc8   :  { %v493_v53 = vcombine.low %v266_v52, %v268_v51 }
  0xca   :  { %v145_v54 = vpop.permute.xlu1 %144  ;;  %v143_v22 = vpop.permute.xlu0 %142  ;;  %519 = vmatmul.mubr.msk.bf16.vlgmr.msra.gmra.mrb[0].mxu0 %vm334_vm5, %v493_v53 }
  0xcb   :  { %v259_v61 = vsel %vm235_vm3, %v234_v41, %v145_v54  ;;  %v257_v62 = vsel %vm235_vm3, %v232_v42, %v143_v22 }
  0xce   :  { %v168_v56 = vpop.permute.xlu1 %167  ;;  %v166_v57 = vpop.permute.xlu0 %165 }
  0xcf   :  { %v280_v58 = vsel %vm260_vm4, %v255_v17, %v168_v56  ;;  %v278_v59 = vsel %vm260_vm4, %v253_v55, %v166_v57 }
  0xd0   :  { %v496_v60 = vcombine.low %v278_v59, %v280_v58 }
  0xd2   :  { %v172_v63 = vpop.permute.xlu1 %171  ;;  %526 = vmatprep.mubr.msk.bf16.mxu1 %vm334_vm5, %v496_v60  ;;  %v170_v0 = vpop.permute.xlu0 %169 }
  0xd3   :  { %v284_v1 = vsel %vm260_vm4, %v259_v61, %v172_v63  ;;  %v282_v2 = vsel %vm260_vm4, %v257_v62, %v170_v0 }
  0xd4   :  { %v497_v3 = vcombine.low %v282_v2, %v284_v1 }
  0xd6   :  { %527 = vmatmul.mubr.msk.bf16.gmra.mrb[4].mxu1 %vm334_vm5, %v497_v3 }
 0x169   :  { %v524_v5 = vpop.f32.mrb[0].mxu1 }
 0x16a   :  { %v407_v6 = vpop.f32.mrb[1].mxu1  ;;  %v416_v11 = vadd.f32 %v524_v5, %v491_v10 }
 0x16b   :  { %v525_v7 = vpop.f32.mrb[2].mxu1  ;;  %v408_v13 = vadd.f32 %v491_v10, %v407_v6 }
 0x16c   :  { %v410_v9 = vpop.f32.mrb[3].mxu1  ;;  %v419_v16 = vadd.f32 %v525_v7, %v491_v10  ;;  %v444_v25 = vmax.f32 %v416_v11, 0.0 }
 0x16d   :  { %v411_v21 = vadd.f32 %v491_v10, %v410_v9  ;;  %v442_v29 = vmax.f32 %v408_v13, 0.0 }
 0x16e   :  { %v445_v4 = vmax.f32 %v419_v16, 0.0 }
 0x16f   :  { %v443_v33 = vmax.f32 %v411_v21, 0.0 }
 0x19d   :  { %v520_v14 = vpop.f32.mrb[0].mxu0 }
 0x19e   :  { %v400_v19 = vadd.f32 %v520_v14, %v491_v10  ;;  %v391_v20 = vpop.f32.mrb[1].mxu0 }
 0x19f   :  { %v392_v23 = vadd.f32 %v491_v10, %v391_v20  ;;  %v521_v24 = vpop.f32.mrb[2].mxu0 }
 0x1a0   :  { %v440_v26 = vmax.f32 %v400_v19, 0.0  ;;  %v403_v27 = vadd.f32 %v521_v24, %v491_v10  ;;  %v394_v28 = vpop.f32.mrb[3].mxu0 }
 0x1a1   :  { %v438_v8 = vmax.f32 %v392_v23, 0.0  ;;  %v395_v30 = vadd.f32 %v491_v10, %v394_v28 }
 0x1a2   :  { %v452_v31 = vmax.f32 %v440_v26, %v444_v25  ;;  %v441_v32 = vmax.f32 %v403_v27, 0.0 }
 0x1a3   :  { %v450_v34 = vmax.f32 %v438_v8, %v442_v29  ;;  %v439_v35 = vmax.f32 %v395_v30, 0.0 }
 0x1a4   :  { %v453_v36 = vmax.f32 %v441_v32, %v445_v4 }
 0x1a5   :  { %v451_v37 = vmax.f32 %v439_v35, %v443_v33 }
 0x1a9   :  { %v528_v18 = vpop.f32.mrb[4].mxu1 }
 0x1aa   :  { %v432_v38 = vadd.f32 %v528_v18, %v491_v10  ;;  %v423_v39 = vpop.f32.mrb[5].mxu1 }
 0x1ab   :  { %v424_v40 = vadd.f32 %v491_v10, %v423_v39  ;;  %v529_v41 = vpop.f32.mrb[6].mxu1 }
 0x1ac   :  { %v448_v42 = vmax.f32 %v432_v38, 0.0  ;;  %v435_v43 = vadd.f32 %v529_v41, %v491_v10  ;;  %v426_v44 = vpop.f32.mrb[7].mxu1 }
 0x1ad   :  { %v446_v45 = vmax.f32 %v424_v40, 0.0  ;;  %v427_v46 = vadd.f32 %v491_v10, %v426_v44 }
 0x1ae   :  { %v456_v15 = vmax.f32 %v452_v31, %v448_v42  ;;  %v449_v12 = vmax.f32 %v435_v43, 0.0 }
 0x1af   :  { %v454_v47 = vmax.f32 %v450_v34, %v446_v45  ;;  %v447_v48 = vmax.f32 %v427_v46, 0.0 }
 0x1b0   :  { %v457_v49 = vmax.f32 %v453_v36, %v449_v12 }
 0x1b1   :  { %v455_v50 = vmax.f32 %v451_v37, %v447_v48 }
 0x1b2   :  { %v459_v51 = vmax.f32 %v456_v15, %v457_v49 }
 0x1b3   :  { %v458_v52 = vmax.f32 %v454_v47, %v455_v50 }
 0x1b5   :  { %v460_v53 = vmax.f32 %v458_v52, %v459_v51 }
 0x1b7   :  { %461 = vst [vmem:[#allocation2] sm:$0xff] %v460_v53 }
 0x1b8   :  { %569 = shalt.err (!%p566_p4)
}
 0x1b9   :  { %s570_s29 = scalar_lea.hbm %s849_s3, 128 }
 0x1ba   :  { %p571_p5 = scmp.ne.s32.totalorder %s849_s3, %s570_s29  ;;  %p574_p6 = scmp.lt.u32.totalorder %s570_s29, %s849_s3 }
 0x1bc   :  { %p576_p7 = pnand %p574_p6, %p571_p5 }
 0x1be   :  { %579 = shalt.err (!%p576_p7)
}
 0x1bf   :  { %471 = dma.vmem_to_hbm [thread:$0]  %s469_s25, 128, %s849_s3, [#allocation3]  }
 0x1c0   :  { %580 = dma.done.wait [#allocation3], 128  }
 0x1c1   :  { %581 = vsyncadd [#allocation3], 4294967168 }
 0x1c2   :  { %475 = vsyncpa [#allocation3], 1 }

</bundles_post_ra>
